<compile_context>
chip_gen: v5e
topology: v5e:2x2
jax: 0.10.0
libtpu: 0.0.40
codegen_flags: <defaults>
</compile_context>

<pallas_src>
import math
import functools

import jax
import jax.numpy as jnp
from jax import lax
from jax.experimental import pallas as pl
from jax.experimental.pallas import tpu as pltpu


# ---------------------------------------------------------------------------
# Fused per-batch kernel: projections (head-batched), per-head masked softmax
# attention, head-concat y, and the output projection.
# ---------------------------------------------------------------------------
def _mha_fused_kernel(scale, n_h, d_attn, d_mid, return_intermediates, use_bf16,
                      x_ref, z_ref, m_ref,
                      wq_ref, wk_ref, wv_ref, wo_ref,
                      bq_ref, bk_ref, bv_ref, bo_ref,
                      *out_refs):
    f32 = jnp.float32
    if return_intermediates:
        q_ref, k_ref, v_ref, s_ref, a_ref, y_ref, vt_ref = out_refs
    else:
        y_ref, vt_ref = out_refs

    x = x_ref[0]                      # (l_x, d_x)
    z = z_ref[0]                      # (l_z, d_z)
    mf = m_ref[0].astype(f32)         # (l_x, l_z), 1.0 attend / 0.0 don't

    def mx(a):
        # Optional bf16 MXU operands (f32 accumulation via preferred_element_type).
        return a.astype(jnp.bfloat16) if use_bf16 else a

    # Head-batched projections: single lane-dense matmul per input, weights are
    # the full head-concatenated (d_in, n_h*d_head) blocks, VMEM-resident.
    q = jnp.dot(mx(x), mx(wq_ref[...]), preferred_element_type=f32) + bq_ref[...]
    k = jnp.dot(mx(z), mx(wk_ref[...]), preferred_element_type=f32) + bk_ref[...]
    v = jnp.dot(mx(z), mx(wv_ref[...]), preferred_element_type=f32) + bv_ref[...]

    attend = mf > 0.0
    neg = jnp.finfo(f32).min          # scores stay f32 even on the bf16 path

    y_parts = []
    for h in range(n_h):              # static unrolled loop over heads
        qh = q[:, h * d_attn:(h + 1) * d_attn]        # (l_x, d_attn)
        kh = k[:, h * d_attn:(h + 1) * d_attn]        # (l_z, d_attn)
        vh = v[:, h * d_mid:(h + 1) * d_mid]          # (l_z, d_mid)

        # Scores: contract on the last dim of both operands (no k.T transpose).
        sh = lax.dot_general(mx(qh), mx(kh),
                             dimension_numbers=(((1,), (1,)), ((), ())),
                             preferred_element_type=f32) * scale
        sh = jnp.where(attend, sh, neg)

        # Softmax over l_z (f32 VPU math; reciprocal on the EUP slot), then
        # explicitly zero where mask == 0 (matches the PyTorch module).
        e = jnp.exp(sh - jnp.max(sh, axis=-1, keepdims=True))
        denom = jnp.sum(e, axis=-1, keepdims=True)
        ah = e * pl.reciprocal(denom, approx=True) * mf

        yh = jnp.dot(mx(ah), mx(vh), preferred_element_type=f32)   # (l_x, d_mid)
        y_parts.append(yh)

        if return_intermediates:
            s_ref[0, h] = sh
            a_ref[0, h] = ah

    # Head-concatenated y (lane-dense) + fused output projection.
    y = y_parts[0] if n_h == 1 else jnp.concatenate(y_parts, axis=-1)
    vt = jnp.dot(mx(y), mx(wo_ref[...]), preferred_element_type=f32) + bo_ref[...]

    if return_intermediates:
        q_ref[...] = q[None]
        k_ref[...] = k[None]
        v_ref[...] = v[None]
    y_ref[...] = y[None]
    vt_ref[...] = vt[None]


def multi_head_attention(x, z, mask, params, *, d_attn,
                         return_intermediates=True, use_bf16_matmul=False):
    """Runs the MHA forward pass; returns the same dict of outputs as the
    PyTorch module (when return_intermediates=True)."""
    w_q, w_k, w_v, w_o = params["w_q"], params["w_k"], params["w_v"], params["w_o"]
    b_q, b_k, b_v, b_o = params["b_q"], params["b_k"], params["b_v"], params["b_o"]

    b, l_x, d_x = x.shape
    _, l_z, d_z = z.shape
    n_h = w_q.shape[0]
    d_mid = w_v.shape[-1]
    d_out = w_o.shape[-1]
    scale = 1.0 / math.sqrt(d_attn)
    f32 = jnp.float32

    # Head-concatenated parameters: (n_h, d_in, d_head) -> (d_in, n_h*d_head)
    # so each projection is one lane-dense matmul.
    wq_cat = jnp.transpose(w_q, (1, 0, 2)).reshape(d_x, n_h * d_attn)
    wk_cat = jnp.transpose(w_k, (1, 0, 2)).reshape(d_z, n_h * d_attn)
    wv_cat = jnp.transpose(w_v, (1, 0, 2)).reshape(d_z, n_h * d_mid)
    bq_cat = b_q.reshape(1, n_h * d_attn)
    bk_cat = b_k.reshape(1, n_h * d_attn)
    bv_cat = b_v.reshape(1, n_h * d_mid)
    bo2 = b_o.reshape(1, d_out)

    out_shapes, out_specs = [], []
    if return_intermediates:
        out_shapes += [
            jax.ShapeDtypeStruct((b, l_x, n_h * d_attn), f32),   # q (head-concat)
            jax.ShapeDtypeStruct((b, l_z, n_h * d_attn), f32),   # k (head-concat)
            jax.ShapeDtypeStruct((b, l_z, n_h * d_mid), f32),    # v (head-concat)
            jax.ShapeDtypeStruct((b, n_h, l_x, l_z), f32),       # score
            jax.ShapeDtypeStruct((b, n_h, l_x, l_z), f32),       # attention
        ]
        out_specs += [
            pl.BlockSpec((1, l_x, n_h * d_attn), lambda i: (i, 0, 0)),
            pl.BlockSpec((1, l_z, n_h * d_attn), lambda i: (i, 0, 0)),
            pl.BlockSpec((1, l_z, n_h * d_mid), lambda i: (i, 0, 0)),
            pl.BlockSpec((1, n_h, l_x, l_z), lambda i: (i, 0, 0, 0)),
            pl.BlockSpec((1, n_h, l_x, l_z), lambda i: (i, 0, 0, 0)),
        ]
    out_shapes += [
        jax.ShapeDtypeStruct((b, l_x, n_h * d_mid), f32),        # y
        jax.ShapeDtypeStruct((b, l_x, d_out), f32),              # vtilde
    ]
    out_specs += [
        pl.BlockSpec((1, l_x, n_h * d_mid), lambda i: (i, 0, 0)),
        pl.BlockSpec((1, l_x, d_out), lambda i: (i, 0, 0)),
    ]

    in_specs = [
        pl.BlockSpec((1, l_x, d_x), lambda i: (i, 0, 0)),        # x
        pl.BlockSpec((1, l_z, d_z), lambda i: (i, 0, 0)),        # z
        pl.BlockSpec((1, l_x, l_z), lambda i: (i, 0, 0)),        # mask
        pl.BlockSpec((d_x, n_h * d_attn), lambda i: (0, 0)),     # wq_cat (resident)
        pl.BlockSpec((d_z, n_h * d_attn), lambda i: (0, 0)),     # wk_cat (resident)
        pl.BlockSpec((d_z, n_h * d_mid), lambda i: (0, 0)),      # wv_cat (resident)
        pl.BlockSpec((n_h * d_mid, d_out), lambda i: (0, 0)),    # w_o    (resident)
        pl.BlockSpec((1, n_h * d_attn), lambda i: (0, 0)),       # bq_cat
        pl.BlockSpec((1, n_h * d_attn), lambda i: (0, 0)),       # bk_cat
        pl.BlockSpec((1, n_h * d_mid), lambda i: (0, 0)),        # bv_cat
        pl.BlockSpec((1, d_out), lambda i: (0, 0)),              # b_o
    ]

    kernel = functools.partial(
        _mha_fused_kernel, scale, n_h, d_attn, d_mid,
        return_intermediates, use_bf16_matmul)

    outs = pl.pallas_call(
        kernel,
        out_shape=tuple(out_shapes),
        grid_spec=pltpu.PrefetchScalarGridSpec(
            num_scalar_prefetch=0,
            grid=(b,),
            in_specs=in_specs,
            out_specs=out_specs,
        ),
        compiler_params=pltpu.CompilerParams(
            dimension_semantics=("parallel",)),
    )(x, z, mask, wq_cat, wk_cat, wv_cat, w_o, bq_cat, bk_cat, bv_cat, bo2)

    if return_intermediates:
        q_cat, k_cat, v_cat, score, attention, y, vtilde = outs
        # Plain-JAX glue to the module's [b, n_h, l, d] layouts for the debug
        # tensors (kernel stores are lane-dense / head-concatenated).
        q = jnp.transpose(q_cat.reshape(b, l_x, n_h, d_attn), (0, 2, 1, 3))
        k = jnp.transpose(k_cat.reshape(b, l_z, n_h, d_attn), (0, 2, 1, 3))
        v = jnp.transpose(v_cat.reshape(b, l_z, n_h, d_mid), (0, 2, 1, 3))
        yh = jnp.transpose(y.reshape(b, l_x, n_h, d_mid), (0, 2, 1, 3))
        return {"q": q, "k": k, "v": v, "score": score, "attention": attention,
                "yh": yh, "y": y, "vtilde": vtilde}
    else:
        y, vtilde = outs
        return {"y": y, "vtilde": vtilde}


# ---------------------------------------------------------------------------
# Deterministic parameter initialization (xavier-normal-like, zero biases)
# ---------------------------------------------------------------------------
def init_params(key, d_x, d_z, d_attn, d_mid, n_h, d_out):
    k1, k2, k3, k4 = jax.random.split(key, 4)

    def xavier(k, shape, fan_in, fan_out):
        std = math.sqrt(2.0 / (fan_in + fan_out))
        return jax.random.normal(k, shape, dtype=jnp.float32) * std

    return {
        "w_q": xavier(k1, (n_h, d_x, d_attn), d_x, d_attn),
        "w_k": xavier(k2, (n_h, d_z, d_attn), d_z, d_attn),
        "w_v": xavier(k3, (n_h, d_z, d_mid), d_z, d_mid),
        "w_o": xavier(k4, (n_h * d_mid, d_out), n_h * d_mid, d_out),
        "b_q": jnp.zeros((n_h, d_attn), jnp.float32),
        "b_k": jnp.zeros((n_h, d_attn), jnp.float32),
        "b_v": jnp.zeros((n_h, d_mid), jnp.float32),
        "b_o": jnp.zeros((d_out,), jnp.float32),
    }


if __name__ == "__main__":
    # small shapes consistent with the module
    b, l_x, l_z = 2, 8, 8
    d_x, d_z, d_attn, d_mid, n_h, d_out = 16, 16, 16, 16, 2, 32

    key = jax.random.PRNGKey(0)
    kx, kz, km, kp = jax.random.split(key, 4)

    x = jax.random.normal(kx, (b, l_x, d_x), dtype=jnp.float32)
    z = jax.random.normal(kz, (b, l_z, d_z), dtype=jnp.float32)
    # binary mask (1 = attend, 0 = don't)
    mask = (jax.random.uniform(km, (b, l_x, l_z)) > 0.2).astype(jnp.float32)

    params = init_params(kp, d_x, d_z, d_attn, d_mid, n_h, d_out)

    outs = multi_head_attention(x, z, mask, params, d_attn=d_attn)
    jax.block_until_ready(outs)

    # pure-JAX reference
    q_ref = jnp.einsum('bik,hkj->bhij', x, params["w_q"]) + params["b_q"][None, :, None, :]
    k_ref = jnp.einsum('bik,hkj->bhij', z, params["w_k"]) + params["b_k"][None, :, None, :]
    v_ref = jnp.einsum('bik,hkj->bhij', z, params["w_v"]) + params["b_v"][None, :, None, :]
    s_ref = jnp.einsum('bhik,bhjk->bhij', q_ref, k_ref) / math.sqrt(d_attn)
    s_ref = jnp.where(mask[:, None] > 0, s_ref, jnp.finfo(jnp.float32).min)
    a_ref = jax.nn.softmax(s_ref, axis=-1) * mask[:, None]
    yh_ref = a_ref @ v_ref
    y_ref = jnp.transpose(yh_ref, (0, 2, 1, 3)).reshape(b, l_x, n_h * d_mid)
    vt_ref = y_ref @ params["w_o"] + params["b_o"]

    # exact (f32-accumulated MXU) outputs
    assert jnp.allclose(outs["q"], q_ref, atol=1e-4, rtol=1e-4)
    assert jnp.allclose(outs["k"], k_ref, atol=1e-4, rtol=1e-4)
    assert jnp.allclose(outs["v"], v_ref, atol=1e-4, rtol=1e-4)
    assert jnp.allclose(outs["score"], s_ref, atol=1e-4, rtol=1e-4)
    # outputs downstream of the approximate (EUP) reciprocal in the softmax
    assert jnp.allclose(outs["attention"], a_ref, atol=1e-2, rtol=1e-2)
    assert jnp.allclose(outs["yh"], yh_ref, atol=1e-2, rtol=1e-2)
    assert jnp.allclose(outs["y"], y_ref, atol=1e-2, rtol=1e-2)
    assert jnp.allclose(outs["vtilde"], vt_ref, atol=1e-2, rtol=1e-2)

    # fast path: only y / vtilde written (no debug intermediates to HBM)
    fast = multi_head_attention(x, z, mask, params, d_attn=d_attn,
                                return_intermediates=False)
    jax.block_until_ready(fast)
    assert jnp.allclose(fast["vtilde"], outs["vtilde"], atol=1e-5, rtol=1e-5)

    # bf16 MXU-operand path (v5e/v6e/v7x throughput), f32 accumulation
    bf16 = multi_head_attention(x, z, mask, params, d_attn=d_attn,
                                return_intermediates=False, use_bf16_matmul=True)
    jax.block_until_ready(bf16)
    assert bool(jnp.all(jnp.isfinite(bf16["vtilde"])))

    print("KERNEL_OK")
</pallas_src>

<mosaic_0001>
module attributes {stable_mosaic.version = 11 : i64} {
  func.func @_mha_fused_kernel(%arg0: i32, %arg1: memref<1x8x16xf32, #tpu.memory_space<vmem>>, %arg2: memref<1x8x16xf32, #tpu.memory_space<vmem>>, %arg3: memref<1x8x8xf32, #tpu.memory_space<vmem>>, %arg4: memref<16x32xf32, #tpu.memory_space<vmem>>, %arg5: memref<16x32xf32, #tpu.memory_space<vmem>>, %arg6: memref<16x32xf32, #tpu.memory_space<vmem>>, %arg7: memref<32x32xf32, #tpu.memory_space<vmem>>, %arg8: memref<1x32xf32, #tpu.memory_space<vmem>>, %arg9: memref<1x32xf32, #tpu.memory_space<vmem>>, %arg10: memref<1x32xf32, #tpu.memory_space<vmem>>, %arg11: memref<1x32xf32, #tpu.memory_space<vmem>>, %arg12: memref<1x8x32xf32, #tpu.memory_space<vmem>>, %arg13: memref<1x8x32xf32, #tpu.memory_space<vmem>>, %arg14: memref<1x8x32xf32, #tpu.memory_space<vmem>>, %arg15: memref<1x2x8x8xf32, #tpu.memory_space<vmem>>, %arg16: memref<1x2x8x8xf32, #tpu.memory_space<vmem>>, %arg17: memref<1x8x32xf32, #tpu.memory_space<vmem>>, %arg18: memref<1x8x32xf32, #tpu.memory_space<vmem>>) attributes {dimension_semantics = [#tpu.dimension_semantics<parallel>], iteration_bounds = array<i64: 2>, scalar_prefetch = 0 : i64, scratch_operands = 0 : i64, tpu.core_type = #tpu.core_type<tc>, window_params = [{transform_indices = @transform_0, window_bounds = array<i64: 1, 8, 16>}, {transform_indices = @transform_1, window_bounds = array<i64: 1, 8, 16>}, {transform_indices = @transform_2, window_bounds = array<i64: 1, 8, 8>}, {pipeline_mode = #tpu.pipeline_mode<synchronous>, transform_indices = @transform_3, window_bounds = array<i64: 16, 32>}, {pipeline_mode = #tpu.pipeline_mode<synchronous>, transform_indices = @transform_4, window_bounds = array<i64: 16, 32>}, {pipeline_mode = #tpu.pipeline_mode<synchronous>, transform_indices = @transform_5, window_bounds = array<i64: 16, 32>}, {pipeline_mode = #tpu.pipeline_mode<synchronous>, transform_indices = @transform_6, window_bounds = array<i64: 32, 32>}, {pipeline_mode = #tpu.pipeline_mode<synchronous>, transform_indices = @transform_7, window_bounds = array<i64: 1, 32>}, {pipeline_mode = #tpu.pipeline_mode<synchronous>, transform_indices = @transform_8, window_bounds = array<i64: 1, 32>}, {pipeline_mode = #tpu.pipeline_mode<synchronous>, transform_indices = @transform_9, window_bounds = array<i64: 1, 32>}, {pipeline_mode = #tpu.pipeline_mode<synchronous>, transform_indices = @transform_10, window_bounds = array<i64: 1, 32>}, {transform_indices = @transform_11, window_bounds = array<i64: 1, 8, 32>}, {transform_indices = @transform_12, window_bounds = array<i64: 1, 8, 32>}, {transform_indices = @transform_13, window_bounds = array<i64: 1, 8, 32>}, {transform_indices = @transform_14, window_bounds = array<i64: 1, 2, 8, 8>}, {transform_indices = @transform_15, window_bounds = array<i64: 1, 2, 8, 8>}, {transform_indices = @transform_16, window_bounds = array<i64: 1, 8, 32>}, {transform_indices = @transform_17, window_bounds = array<i64: 1, 8, 32>}]} {
    %c0 = arith.constant 0 : index
    %c0_0 = arith.constant 0 : index
    %c0_1 = arith.constant 0 : index
    %0 = vector.load %arg1[%c0, %c0_0, %c0_1] : memref<1x8x16xf32, #tpu.memory_space<vmem>>, vector<1x8x16xf32>
    %1 = vector.shape_cast %0 : vector<1x8x16xf32> to vector<8x16xf32>
    %c0_2 = arith.constant 0 : index
    %c0_3 = arith.constant 0 : index
    %c0_4 = arith.constant 0 : index
    %2 = vector.load %arg2[%c0_2, %c0_3, %c0_4] : memref<1x8x16xf32, #tpu.memory_space<vmem>>, vector<1x8x16xf32>
    %3 = vector.shape_cast %2 : vector<1x8x16xf32> to vector<8x16xf32>
    %c0_5 = arith.constant 0 : index
    %c0_6 = arith.constant 0 : index
    %c0_7 = arith.constant 0 : index
    %4 = vector.load %arg3[%c0_5, %c0_6, %c0_7] : memref<1x8x8xf32, #tpu.memory_space<vmem>>, vector<1x8x8xf32>
    %5 = vector.shape_cast %4 : vector<1x8x8xf32> to vector<8x8xf32>
    %c0_8 = arith.constant 0 : index
    %c0_9 = arith.constant 0 : index
    %6 = vector.load %arg4[%c0_8, %c0_9] : memref<16x32xf32, #tpu.memory_space<vmem>>, vector<16x32xf32>
    %cst = arith.constant dense<0.000000e+00> : vector<8x32xf32>
    %7 = tpu.matmul %1, %6, %cst {dimension_numbers = #tpu.dot_dimension_numbers<[1], [0], [0], [1], [0, 0, 1, 1], [], []>} : vector<8x16xf32>, vector<16x32xf32>, vector<8x32xf32> -> vector<8x32xf32>
    %c0_10 = arith.constant 0 : index
    %c0_11 = arith.constant 0 : index
    %8 = vector.load %arg8[%c0_10, %c0_11] : memref<1x32xf32, #tpu.memory_space<vmem>>, vector<1x32xf32>
    %9 = vector.broadcast %8 : vector<1x32xf32> to vector<8x32xf32>
    %10 = arith.addf %7, %9 : vector<8x32xf32>
    %c0_12 = arith.constant 0 : index
    %c0_13 = arith.constant 0 : index
    %11 = vector.load %arg5[%c0_12, %c0_13] : memref<16x32xf32, #tpu.memory_space<vmem>>, vector<16x32xf32>
    %cst_14 = arith.constant dense<0.000000e+00> : vector<8x32xf32>
    %12 = tpu.matmul %3, %11, %cst_14 {dimension_numbers = #tpu.dot_dimension_numbers<[1], [0], [0], [1], [0, 0, 1, 1], [], []>} : vector<8x16xf32>, vector<16x32xf32>, vector<8x32xf32> -> vector<8x32xf32>
    %c0_15 = arith.constant 0 : index
    %c0_16 = arith.constant 0 : index
    %13 = vector.load %arg9[%c0_15, %c0_16] : memref<1x32xf32, #tpu.memory_space<vmem>>, vector<1x32xf32>
    %14 = vector.broadcast %13 : vector<1x32xf32> to vector<8x32xf32>
    %15 = arith.addf %12, %14 : vector<8x32xf32>
    %c0_17 = arith.constant 0 : index
    %c0_18 = arith.constant 0 : index
    %16 = vector.load %arg6[%c0_17, %c0_18] : memref<16x32xf32, #tpu.memory_space<vmem>>, vector<16x32xf32>
    %cst_19 = arith.constant dense<0.000000e+00> : vector<8x32xf32>
    %17 = tpu.matmul %3, %16, %cst_19 {dimension_numbers = #tpu.dot_dimension_numbers<[1], [0], [0], [1], [0, 0, 1, 1], [], []>} : vector<8x16xf32>, vector<16x32xf32>, vector<8x32xf32> -> vector<8x32xf32>
    %c0_20 = arith.constant 0 : index
    %c0_21 = arith.constant 0 : index
    %18 = vector.load %arg10[%c0_20, %c0_21] : memref<1x32xf32, #tpu.memory_space<vmem>>, vector<1x32xf32>
    %19 = vector.broadcast %18 : vector<1x32xf32> to vector<8x32xf32>
    %20 = arith.addf %17, %19 : vector<8x32xf32>
    %cst_22 = arith.constant 0.000000e+00 : f32
    %21 = vector.broadcast %cst_22 : f32 to vector<8x8xf32>
    %22 = arith.cmpf ogt, %5, %21 : vector<8x8xf32>
    %23 = vector.extract_strided_slice %10 {offsets = [0, 0], sizes = [8, 16], strides = [1, 1]} : vector<8x32xf32> to vector<8x16xf32>
    %24 = vector.extract_strided_slice %15 {offsets = [0, 0], sizes = [8, 16], strides = [1, 1]} : vector<8x32xf32> to vector<8x16xf32>
    %25 = vector.extract_strided_slice %20 {offsets = [0, 0], sizes = [8, 16], strides = [1, 1]} : vector<8x32xf32> to vector<8x16xf32>
    %cst_23 = arith.constant dense<0.000000e+00> : vector<8x8xf32>
    %26 = tpu.matmul %23, %24, %cst_23 {dimension_numbers = #tpu.dot_dimension_numbers<[1], [1], [0], [0], [0, 0, 1, 0], [], []>} : vector<8x16xf32>, vector<8x16xf32>, vector<8x8xf32> -> vector<8x8xf32>
    %cst_24 = arith.constant 2.500000e-01 : f32
    %27 = vector.broadcast %cst_24 : f32 to vector<8x8xf32>
    %28 = arith.mulf %26, %27 : vector<8x8xf32>
    %cst_25 = arith.constant -3.40282347E+38 : f32
    %29 = vector.broadcast %cst_25 : f32 to vector<8x8xf32>
    %30 = arith.select %22, %28, %29 : vector<8x8xi1>, vector<8x8xf32>
    %cst_26 = arith.constant dense<0xFF800000> : vector<8xf32>
    %31 = vector.multi_reduction <maximumf>, %30, %cst_26 [1] : vector<8x8xf32> to vector<8xf32>
    %32 = vector.shape_cast %31 : vector<8xf32> to vector<8x1xf32>
    %33 = vector.broadcast %32 : vector<8x1xf32> to vector<8x8xf32>
    %34 = arith.subf %30, %33 : vector<8x8xf32>
    %35 = math.exp %34 : vector<8x8xf32>
    %cst_27 = arith.constant dense<0.000000e+00> : vector<8xf32>
    %36 = vector.multi_reduction <add>, %35, %cst_27 [1] : vector<8x8xf32> to vector<8xf32>
    %37 = vector.shape_cast %36 : vector<8xf32> to vector<8x1xf32>
    %38 = tpu.reciprocal %37 {approx = true} : vector<8x1xf32> -> vector<8x1xf32>
    %39 = vector.broadcast %38 : vector<8x1xf32> to vector<8x8xf32>
    %40 = arith.mulf %35, %39 : vector<8x8xf32>
    %41 = arith.mulf %40, %5 : vector<8x8xf32>
    %cst_28 = arith.constant dense<0.000000e+00> : vector<8x16xf32>
    %42 = tpu.matmul %41, %25, %cst_28 {dimension_numbers = #tpu.dot_dimension_numbers<[1], [0], [0], [1], [0, 0, 1, 1], [], []>} : vector<8x8xf32>, vector<8x16xf32>, vector<8x16xf32> -> vector<8x16xf32>
    %c0_29 = arith.constant 0 : index
    %c0_30 = arith.constant 0 : index
    %c0_31 = arith.constant 0 : index
    %c0_32 = arith.constant 0 : index
    %43 = vector.load %arg15[%c0_29, %c0_30, %c0_31, %c0_32] : memref<1x2x8x8xf32, #tpu.memory_space<vmem>>, vector<1x1x8x8xf32>
    %44 = vector.shape_cast %43 : vector<1x1x8x8xf32> to vector<8x8xf32>
    %45 = vector.shape_cast %30 : vector<8x8xf32> to vector<1x1x8x8xf32>
    tpu.vector_store %arg15[%c0_29, %c0_30, %c0_31, %c0_32], %45 {strides = array<i32>} : memref<1x2x8x8xf32, #tpu.memory_space<vmem>>, vector<1x1x8x8xf32>,
    %c0_33 = arith.constant 0 : index
    %c0_34 = arith.constant 0 : index
    %c0_35 = arith.constant 0 : index
    %c0_36 = arith.constant 0 : index
    %46 = vector.load %arg16[%c0_33, %c0_34, %c0_35, %c0_36] : memref<1x2x8x8xf32, #tpu.memory_space<vmem>>, vector<1x1x8x8xf32>
    %47 = vector.shape_cast %46 : vector<1x1x8x8xf32> to vector<8x8xf32>
    %48 = vector.shape_cast %41 : vector<8x8xf32> to vector<1x1x8x8xf32>
    tpu.vector_store %arg16[%c0_33, %c0_34, %c0_35, %c0_36], %48 {strides = array<i32>} : memref<1x2x8x8xf32, #tpu.memory_space<vmem>>, vector<1x1x8x8xf32>,
    %49 = vector.extract_strided_slice %10 {offsets = [0, 16], sizes = [8, 16], strides = [1, 1]} : vector<8x32xf32> to vector<8x16xf32>
    %50 = vector.extract_strided_slice %15 {offsets = [0, 16], sizes = [8, 16], strides = [1, 1]} : vector<8x32xf32> to vector<8x16xf32>
    %51 = vector.extract_strided_slice %20 {offsets = [0, 16], sizes = [8, 16], strides = [1, 1]} : vector<8x32xf32> to vector<8x16xf32>
    %cst_37 = arith.constant dense<0.000000e+00> : vector<8x8xf32>
    %52 = tpu.matmul %49, %50, %cst_37 {dimension_numbers = #tpu.dot_dimension_numbers<[1], [1], [0], [0], [0, 0, 1, 0], [], []>} : vector<8x16xf32>, vector<8x16xf32>, vector<8x8xf32> -> vector<8x8xf32>
    %cst_38 = arith.constant 2.500000e-01 : f32
    %53 = vector.broadcast %cst_38 : f32 to vector<8x8xf32>
    %54 = arith.mulf %52, %53 : vector<8x8xf32>
    %cst_39 = arith.constant -3.40282347E+38 : f32
    %55 = vector.broadcast %cst_39 : f32 to vector<8x8xf32>
    %56 = arith.select %22, %54, %55 : vector<8x8xi1>, vector<8x8xf32>
    %cst_40 = arith.constant dense<0xFF800000> : vector<8xf32>
    %57 = vector.multi_reduction <maximumf>, %56, %cst_40 [1] : vector<8x8xf32> to vector<8xf32>
    %58 = vector.shape_cast %57 : vector<8xf32> to vector<8x1xf32>
    %59 = vector.broadcast %58 : vector<8x1xf32> to vector<8x8xf32>
    %60 = arith.subf %56, %59 : vector<8x8xf32>
    %61 = math.exp %60 : vector<8x8xf32>
    %cst_41 = arith.constant dense<0.000000e+00> : vector<8xf32>
    %62 = vector.multi_reduction <add>, %61, %cst_41 [1] : vector<8x8xf32> to vector<8xf32>
    %63 = vector.shape_cast %62 : vector<8xf32> to vector<8x1xf32>
    %64 = tpu.reciprocal %63 {approx = true} : vector<8x1xf32> -> vector<8x1xf32>
    %65 = vector.broadcast %64 : vector<8x1xf32> to vector<8x8xf32>
    %66 = arith.mulf %61, %65 : vector<8x8xf32>
    %67 = arith.mulf %66, %5 : vector<8x8xf32>
    %cst_42 = arith.constant dense<0.000000e+00> : vector<8x16xf32>
    %68 = tpu.matmul %67, %51, %cst_42 {dimension_numbers = #tpu.dot_dimension_numbers<[1], [0], [0], [1], [0, 0, 1, 1], [], []>} : vector<8x8xf32>, vector<8x16xf32>, vector<8x16xf32> -> vector<8x16xf32>
    %c0_43 = arith.constant 0 : index
    %c1 = arith.constant 1 : index
    %c0_44 = arith.constant 0 : index
    %c0_45 = arith.constant 0 : index
    %69 = vector.load %arg15[%c0_43, %c1, %c0_44, %c0_45] : memref<1x2x8x8xf32, #tpu.memory_space<vmem>>, vector<1x1x8x8xf32>
    %70 = vector.shape_cast %69 : vector<1x1x8x8xf32> to vector<8x8xf32>
    %71 = vector.shape_cast %56 : vector<8x8xf32> to vector<1x1x8x8xf32>
    tpu.vector_store %arg15[%c0_43, %c1, %c0_44, %c0_45], %71 {strides = array<i32>} : memref<1x2x8x8xf32, #tpu.memory_space<vmem>>, vector<1x1x8x8xf32>,
    %c0_46 = arith.constant 0 : index
    %c1_47 = arith.constant 1 : index
    %c0_48 = arith.constant 0 : index
    %c0_49 = arith.constant 0 : index
    %72 = vector.load %arg16[%c0_46, %c1_47, %c0_48, %c0_49] : memref<1x2x8x8xf32, #tpu.memory_space<vmem>>, vector<1x1x8x8xf32>
    %73 = vector.shape_cast %72 : vector<1x1x8x8xf32> to vector<8x8xf32>
    %74 = vector.shape_cast %67 : vector<8x8xf32> to vector<1x1x8x8xf32>
    tpu.vector_store %arg16[%c0_46, %c1_47, %c0_48, %c0_49], %74 {strides = array<i32>} : memref<1x2x8x8xf32, #tpu.memory_space<vmem>>, vector<1x1x8x8xf32>,
    %75 = tpu.concatenate %42, %68 in 1 : vector<8x16xf32>, vector<8x16xf32> -> vector<8x32xf32>
    %c0_50 = arith.constant 0 : index
    %c0_51 = arith.constant 0 : index
    %76 = vector.load %arg7[%c0_50, %c0_51] : memref<32x32xf32, #tpu.memory_space<vmem>>, vector<32x32xf32>
    %cst_52 = arith.constant dense<0.000000e+00> : vector<8x32xf32>
    %77 = tpu.matmul %75, %76, %cst_52 {dimension_numbers = #tpu.dot_dimension_numbers<[1], [0], [0], [1], [0, 0, 1, 1], [], []>} : vector<8x32xf32>, vector<32x32xf32>, vector<8x32xf32> -> vector<8x32xf32>
    %c0_53 = arith.constant 0 : index
    %c0_54 = arith.constant 0 : index
    %78 = vector.load %arg11[%c0_53, %c0_54] : memref<1x32xf32, #tpu.memory_space<vmem>>, vector<1x32xf32>
    %79 = vector.broadcast %78 : vector<1x32xf32> to vector<8x32xf32>
    %80 = arith.addf %77, %79 : vector<8x32xf32>
    %81 = vector.shape_cast %10 : vector<8x32xf32> to vector<1x8x32xf32>
    %c0_55 = arith.constant 0 : index
    %c0_56 = arith.constant 0 : index
    %c0_57 = arith.constant 0 : index
    %82 = vector.load %arg12[%c0_55, %c0_56, %c0_57] : memref<1x8x32xf32, #tpu.memory_space<vmem>>, vector<1x8x32xf32>
    tpu.vector_store %arg12[%c0_55, %c0_56, %c0_57], %81 {strides = array<i32>} : memref<1x8x32xf32, #tpu.memory_space<vmem>>, vector<1x8x32xf32>,
    %83 = vector.shape_cast %15 : vector<8x32xf32> to vector<1x8x32xf32>
    %c0_58 = arith.constant 0 : index
    %c0_59 = arith.constant 0 : index
    %c0_60 = arith.constant 0 : index
    %84 = vector.load %arg13[%c0_58, %c0_59, %c0_60] : memref<1x8x32xf32, #tpu.memory_space<vmem>>, vector<1x8x32xf32>
    tpu.vector_store %arg13[%c0_58, %c0_59, %c0_60], %83 {strides = array<i32>} : memref<1x8x32xf32, #tpu.memory_space<vmem>>, vector<1x8x32xf32>,
    %85 = vector.shape_cast %20 : vector<8x32xf32> to vector<1x8x32xf32>
    %c0_61 = arith.constant 0 : index
    %c0_62 = arith.constant 0 : index
    %c0_63 = arith.constant 0 : index
    %86 = vector.load %arg14[%c0_61, %c0_62, %c0_63] : memref<1x8x32xf32, #tpu.memory_space<vmem>>, vector<1x8x32xf32>
    tpu.vector_store %arg14[%c0_61, %c0_62, %c0_63], %85 {strides = array<i32>} : memref<1x8x32xf32, #tpu.memory_space<vmem>>, vector<1x8x32xf32>,
    %87 = vector.shape_cast %75 : vector<8x32xf32> to vector<1x8x32xf32>
    %c0_64 = arith.constant 0 : index
    %c0_65 = arith.constant 0 : index
    %c0_66 = arith.constant 0 : index
    %88 = vector.load %arg17[%c0_64, %c0_65, %c0_66] : memref<1x8x32xf32, #tpu.memory_space<vmem>>, vector<1x8x32xf32>
    tpu.vector_store %arg17[%c0_64, %c0_65, %c0_66], %87 {strides = array<i32>} : memref<1x8x32xf32, #tpu.memory_space<vmem>>, vector<1x8x32xf32>,
    %89 = vector.shape_cast %80 : vector<8x32xf32> to vector<1x8x32xf32>
    %c0_67 = arith.constant 0 : index
    %c0_68 = arith.constant 0 : index
    %c0_69 = arith.constant 0 : index
    %90 = vector.load %arg18[%c0_67, %c0_68, %c0_69] : memref<1x8x32xf32, #tpu.memory_space<vmem>>, vector<1x8x32xf32>
    tpu.vector_store %arg18[%c0_67, %c0_68, %c0_69], %89 {strides = array<i32>} : memref<1x8x32xf32, #tpu.memory_space<vmem>>, vector<1x8x32xf32>,
    return
  }
  func.func @transform_0(%arg0: i32) -> (i32, i32, i32) {
    %c0_i32 = arith.constant 0 : i32
    %c0_i32_0 = arith.constant 0 : i32
    %c0_i32_1 = arith.constant 0 : i32
    return %arg0, %c0_i32, %c0_i32_0 : i32, i32, i32
  }
  func.func @transform_1(%arg0: i32) -> (i32, i32, i32) {
    %c0_i32 = arith.constant 0 : i32
    %c0_i32_0 = arith.constant 0 : i32
    %c0_i32_1 = arith.constant 0 : i32
    return %arg0, %c0_i32, %c0_i32_0 : i32, i32, i32
  }
  func.func @transform_2(%arg0: i32) -> (i32, i32, i32) {
    %c0_i32 = arith.constant 0 : i32
    %c0_i32_0 = arith.constant 0 : i32
    %c0_i32_1 = arith.constant 0 : i32
    return %arg0, %c0_i32, %c0_i32_0 : i32, i32, i32
  }
  func.func @transform_3(%arg0: i32) -> (i32, i32) {
    %c0_i32 = arith.constant 0 : i32
    %c0_i32_0 = arith.constant 0 : i32
    %c0_i32_1 = arith.constant 0 : i32
    return %c0_i32, %c0_i32_0 : i32, i32
  }
  func.func @transform_4(%arg0: i32) -> (i32, i32) {
    %c0_i32 = arith.constant 0 : i32
    %c0_i32_0 = arith.constant 0 : i32
    %c0_i32_1 = arith.constant 0 : i32
    return %c0_i32, %c0_i32_0 : i32, i32
  }
  func.func @transform_5(%arg0: i32) -> (i32, i32) {
    %c0_i32 = arith.constant 0 : i32
    %c0_i32_0 = arith.constant 0 : i32
    %c0_i32_1 = arith.constant 0 : i32
    return %c0_i32, %c0_i32_0 : i32, i32
  }
  func.func @transform_6(%arg0: i32) -> (i32, i32) {
    %c0_i32 = arith.constant 0 : i32
    %c0_i32_0 = arith.constant 0 : i32
    %c0_i32_1 = arith.constant 0 : i32
    return %c0_i32, %c0_i32_0 : i32, i32
  }
  func.func @transform_7(%arg0: i32) -> (i32, i32) {
    %c0_i32 = arith.constant 0 : i32
    %c0_i32_0 = arith.constant 0 : i32
    %c0_i32_1 = arith.constant 0 : i32
    return %c0_i32, %c0_i32_0 : i32, i32
  }
  func.func @transform_8(%arg0: i32) -> (i32, i32) {
    %c0_i32 = arith.constant 0 : i32
    %c0_i32_0 = arith.constant 0 : i32
    %c0_i32_1 = arith.constant 0 : i32
    return %c0_i32, %c0_i32_0 : i32, i32
  }
  func.func @transform_9(%arg0: i32) -> (i32, i32) {
    %c0_i32 = arith.constant 0 : i32
    %c0_i32_0 = arith.constant 0 : i32
    %c0_i32_1 = arith.constant 0 : i32
    return %c0_i32, %c0_i32_0 : i32, i32
  }
  func.func @transform_10(%arg0: i32) -> (i32, i32) {
    %c0_i32 = arith.constant 0 : i32
    %c0_i32_0 = arith.constant 0 : i32
    %c0_i32_1 = arith.constant 0 : i32
    return %c0_i32, %c0_i32_0 : i32, i32
  }
  func.func @transform_11(%arg0: i32) -> (i32, i32, i32) {
    %c0_i32 = arith.constant 0 : i32
    %c0_i32_0 = arith.constant 0 : i32
    %c0_i32_1 = arith.constant 0 : i32
    return %arg0, %c0_i32, %c0_i32_0 : i32, i32, i32
  }
  func.func @transform_12(%arg0: i32) -> (i32, i32, i32) {
    %c0_i32 = arith.constant 0 : i32
    %c0_i32_0 = arith.constant 0 : i32
    %c0_i32_1 = arith.constant 0 : i32
    return %arg0, %c0_i32, %c0_i32_0 : i32, i32, i32
  }
  func.func @transform_13(%arg0: i32) -> (i32, i32, i32) {
    %c0_i32 = arith.constant 0 : i32
    %c0_i32_0 = arith.constant 0 : i32
    %c0_i32_1 = arith.constant 0 : i32
    return %arg0, %c0_i32, %c0_i32_0 : i32, i32, i32
  }
  func.func @transform_14(%arg0: i32) -> (i32, i32, i32, i32) {
    %c0_i32 = arith.constant 0 : i32
    %c0_i32_0 = arith.constant 0 : i32
    %c0_i32_1 = arith.constant 0 : i32
    %c0_i32_2 = arith.constant 0 : i32
    return %arg0, %c0_i32, %c0_i32_0, %c0_i32_1 : i32, i32, i32, i32
  }
  func.func @transform_15(%arg0: i32) -> (i32, i32, i32, i32) {
    %c0_i32 = arith.constant 0 : i32
    %c0_i32_0 = arith.constant 0 : i32
    %c0_i32_1 = arith.constant 0 : i32
    %c0_i32_2 = arith.constant 0 : i32
    return %arg0, %c0_i32, %c0_i32_0, %c0_i32_1 : i32, i32, i32, i32
  }
  func.func @transform_16(%arg0: i32) -> (i32, i32, i32) {
    %c0_i32 = arith.constant 0 : i32
    %c0_i32_0 = arith.constant 0 : i32
    %c0_i32_1 = arith.constant 0 : i32
    return %arg0, %c0_i32, %c0_i32_0 : i32, i32, i32
  }
  func.func @transform_17(%arg0: i32) -> (i32, i32, i32) {
    %c0_i32 = arith.constant 0 : i32
    %c0_i32_0 = arith.constant 0 : i32
    %c0_i32_1 = arith.constant 0 : i32
    return %arg0, %c0_i32, %c0_i32_0 : i32, i32, i32
  }
}

</mosaic_0001>

<bundles_post_ra>
// kernel: tpu_custom_call.1
= control target key start
LH: loop header
LB: loop body
LE: loop exit
PB: predicated region body
PF: predicated region fallthrough
CT: control target
= control target key end

     0   :  { %s2713_s0 = inlined_call_operand.hbm [shape: f32[2,8,16], index: 0, kind: input, shape index: {}]   ;;  %s2714_s1 = inlined_call_operand.hbm [shape: f32[2,8,16], index: 1, kind: input, shape index: {}]   ;;  %s2715_s2 = inlined_call_operand.hbm [shape: f32[2,8,8], index: 2, kind: input, shape index: {}]   ;;  %s2716_s3 = inlined_call_operand.hbm [shape: f32[16,32], index: 3, kind: input, shape index: {}]   ;;  %s2717_s4 = inlined_call_operand.hbm [shape: f32[16,32], index: 4, kind: input, shape index: {}]   ;;  %s2718_s5 = inlined_call_operand.hbm [shape: f32[16,32], index: 5, kind: input, shape index: {}]   ;;  %s2719_s6 = inlined_call_operand.hbm [shape: f32[32,32], index: 6, kind: input, shape index: {}]   ;;  %s2720_s7 = inlined_call_operand.vmem [shape: f32[1,32], index: 7, kind: input, shape index: {}]   ;;  %s2721_s8 = inlined_call_operand.vmem [shape: f32[1,32], index: 8, kind: input, shape index: {}]   ;;  %s2722_s9 = inlined_call_operand.vmem [shape: f32[1,32], index: 9, kind: input, shape index: {}]   ;;  %s2723_s10 = inlined_call_operand.vmem [shape: f32[1,32], index: 10, kind: input, shape index: {}]   ;;  %s2724_s11 = inlined_call_operand.hbm [shape: f32[2,8,32], index: 11, kind: output, shape index: {0}]   ;;  %s2725_s12 = inlined_call_operand.hbm [shape: f32[2,8,32], index: 12, kind: output, shape index: {1}]   ;;  %s2726_s13 = inlined_call_operand.hbm [shape: f32[2,8,32], index: 13, kind: output, shape index: {2}]   ;;  %s2727_s14 = inlined_call_operand.hbm [shape: f32[2,2,8,8], index: 14, kind: output, shape index: {3}]   ;;  %s2728_s15 = inlined_call_operand.hbm [shape: f32[2,2,8,8], index: 15, kind: output, shape index: {4}]   ;;  %s2729_s16 = inlined_call_operand.hbm [shape: f32[2,8,32], index: 16, kind: output, shape index: {5}]   ;;  %s2730_s17 = inlined_call_operand.hbm [shape: f32[2,8,32], index: 17, kind: output, shape index: {6}]  }
   0x1   :  { %2759 = sst [smem:[#allocation37_spill]] %s2713_s0 }
   0x2   :  { %2760 = sst [smem:[#allocation38_spill]] %s2714_s1 }
   0x3   :  { %2761 = sst [smem:[#allocation39_spill]] %s2715_s2 }
   0x4   :  { %2762 = sst [smem:[#allocation40_spill]] %s2716_s3 }
   0x5   :  { %2763 = sst [smem:[#allocation41_spill]] %s2717_s4 }
   0x6   :  { %2764 = sst [smem:[#allocation42_spill]] %s2718_s5 }
   0x7   :  { %2765 = sst [smem:[#allocation43_spill]] %s2719_s6 }
   0x8   :  { %2766 = sst [smem:[#allocation44_spill]] %s2720_s7 }
   0x9   :  { %2767 = sst [smem:[#allocation45_spill]] %s2721_s8 }
   0xa   :  { %2768 = sst [smem:[#allocation46_spill]] %s2722_s9 }
   0xb   :  { %2769 = sst [smem:[#allocation47_spill]] %s2723_s10 }
   0xc   :  { %2770 = sst [smem:[#allocation48_spill]] %s2724_s11 }
   0xd   :  { %2771 = sst [smem:[#allocation49_spill]] %s2725_s12 }
   0xe   :  { %2772 = sst [smem:[#allocation50_spill]] %s2726_s13 }
   0xf   :  { %2773 = sst [smem:[#allocation51_spill]] %s2727_s14 }
  0x10   :  { %2774 = sst [smem:[#allocation52_spill]] %s2728_s15 }
  0x11   :  { %2775 = sst [smem:[#allocation53_spill]] %s2729_s16 }
  0x12   :  { %2776 = sst [smem:[#allocation54_spill]] %s2730_s17 }
  0x13   :  { %23 = vsyncpa [#allocation3], 0 }
  0x14   :  { %25 = vsyncpa [#allocation3 + $0x1], 0 }
  0x15   :  { %26 = vsyncpa [#allocation6], 0 }
  0x16   :  { %28 = vsyncpa [#allocation6 + $0x1], 0 }
  0x17   :  { %29 = vsyncpa [#allocation9], 0 }
  0x18   :  { %30 = vsyncpa [#allocation12], 0 }
  0x19   :  { %31 = vsyncpa [#allocation4], 0 }
  0x1a   :  { %33 = vsyncpa [#allocation4 + $0x1], 0 }
  0x1b   :  { %34 = vsyncpa [#allocation16], 0 }
  0x1c   :  { %36 = vsyncpa [#allocation16 + $0x1], 0 }
  0x1d   :  { %37 = vsyncpa [#allocation19], 0 }
  0x1e   :  { %39 = vsyncpa [#allocation19 + $0x1], 0 }
  0x1f   :  { %40 = vsyncpa [#allocation22], 0 }
  0x20   :  { %42 = vsyncpa [#allocation22 + $0x1], 0  ;;  %s2280_s24 = smov 0   ;;  %s2282_s25 = smov 0  }
  0x21   :  { %s2284_s26 = smov 0   ;;  %s2286_s27 = smov 0  }
  0x22 LB: > { %2777 = sst [smem:[#allocation32_spill]] %s2166_s24  ;;  %s2304_s30 = sadd.s32 4294967295, %s2178_s27   ;;  %s2178_s27 = sphi %s2286_s27, %s2825_s27   ;;  %s2174_s26 = sphi %s2284_s26, %s2829_s26   ;;  %s2170_s25 = sphi %s2282_s25, %s2828_s25   ;;  %s2166_s24 = sphi %s2280_s24, %s2827_s24  }
  0x23   : > { %2778 = sst [smem:[#allocation33_spill]] %s2178_s27  ;;  %p1506_p0 = scmp.ge.s32.totalorder %s2178_s27, 1 }
  0x24   : > { %s2779_s3 = sld [smem:[#allocation40_spill]]  ;;  %p2750_p1 = scmp.eq.s32.totalorder %s2304_s30, 0 }
  0x25   : > { %p481_p2 = scmp.lt.s32.totalorder %s2178_s27, 3  ;;  %s2180_s19 = smov [#allocation8]  }
  0x26   : > { %s494_s1 = sshll.u32 %s2180_s19, 4  ;;  %s2781_s5 = sld [smem:[#allocation42_spill]]  ;;  %s495_s1 = int_to_ptr.vmem [resolvable:$true] %s494_s1 }
  0x27   : > { %p2309_p3 = pnand %p1506_p0, %p481_p2  ;;  %s2181_s28 = smov [#allocation11]  }
  0x28   : > { %s522_s29 = sshll.u32 %s2181_s28, 4  ;;  %s2733_s19 = smov 128   ;;  %s523_s29 = int_to_ptr.vmem [resolvable:$true] %s522_s29 }
  0x29   : > { %p1601_p4 = pneg %p2309_p3  ;;  %s2735_s20 = smov 8  }
  0x2a   : > { %s492_s0 = sshll.u32 %s2779_s3, 4  ;;  %s2737_s21 = sadd.s32 4294967294, %s2178_s27   ;;  %s493_s0 = int_to_ptr.hbm [resolvable:$true] %s492_s0 }
  0x2b   : > { %p2321_p6 = pnand %p1601_p4, %p2750_p1  ;;  %s2337_s28 = sadd.s32 1, %s2178_s27  }
  0x2c   : > { %s520_s22 = sshll.u32 %s2781_s5, 4  ;;  %2783 = sst [smem:[#allocation34_spill]] %s2337_s28  ;;  %s521_s22 = int_to_ptr.hbm [resolvable:$true] %s520_s22 }
  0x2d   : > { %1604 = dma.hbm_to_vmem [thread:$0]  (!%p2321_p6), %s493_s0, 256, %s495_s1, [#allocation9], %s2733_s19, %s2733_s19, %s2735_s20  }
  0x2e   : > { %1610 = dma.hbm_to_vmem [thread:$0]  (!%p2321_p6), %s521_s22, 256, %s523_s29, [#allocation12], %s2733_s19, %s2733_s19, %s2735_s20  }
  0x2f   : > { %s52_s3 = ssub.s32 %s2178_s27, %s2337_s28  ;;  %s55_s5 = sadd.s32 1, %s2174_s26 }
  0x30   : > { %p53_p7 = scmp.eq.s32.totalorder %s52_s3, 0  ;;  %p62_p8 = scmp.ne.s32.totalorder %s2174_s26, %s2170_s25 }
  0x31   : > { %p63_p9 = scmp.eq.s32.totalorder %s2178_s27, 0  ;;  %p68_p10 = scmp.ne.s32.totalorder %s2170_s25, %s2166_s24 }
  0x32   : > { %s2348_s0 = scalar_select %p53_p7, %s2174_s26, %s55_s5  }
  0x33   : > { %p64_p11 = por %p63_p9, %p62_p8  ;;  %p2352_p12 = por %p2750_p1, %p68_p10 }
  0x34   : > { %2784 = sst [smem:[#allocation35_spill]] %s2348_s0  ;;  %p312_p13 = scmp.eq.s32.totalorder %s2304_s30, 1 }
  0x35   : > { %p318_p0 = scmp.eq.s32.totalorder %s2737_s21, 1  ;;  %p1650_p2 = scmp.lt.s32.totalorder %s2178_s27, 2 }
  0x36   : > { %s2745_s22 = sand.u32 1, %s2174_s26   ;;  %p2361_p4 = por %p312_p13, %p62_p8 }
  0x37   : > { %p2365_p5 = por %p318_p0, %p68_p10  ;;  %s2371_s5 = sshll.u32 %s2745_s22, 3 }
  0x38   : > { %s2374_s19 = sshll.u32 %s2178_s27, 3  ;;  %p2376_p7 = pnand %p1650_p2, %p64_p11 }
  0x39   : > { %s2787_s3 = scalar_select %p2365_p5, 1, 0 }
  0x3a   : > { %s581_s21 = sand.u32 1, %s2178_s27   ;;  %s2790_s24 = sld [smem:[#allocation38_spill]] }
  0x3b   : > { %2788 = sst [smem:[#allocation36_spill]] %s2787_s3  ;;  %s585_s3 = scalar_lea.vmem [#allocation5], %s2371_s5 }
  0x3c   : > { %s593_s11 = sshll.u32 %s585_s3, 4  ;;  %s2386_s22 = scalar_lea.sflag [#allocation6], %s581_s21  ;;  %s594_s11 = int_to_ptr.vmem [resolvable:$true] %s593_s11 }
  0x3d   : > { %p1774_p9 = pneg %p2376_p7 }
  0x40   : > { %s2791_s10 = smov %s2790_s24  ;;  %s589_s17 = scalar_lea.hbm %s2790_s24, %s2374_s19 }
  0x41   : > { %s591_s13 = sshll.u32 %s589_s17, 4  ;;  %s1777_s17 = scalar_lea.hbm %s2791_s10, 16  ;;  %s592_s13 = int_to_ptr.hbm [resolvable:$true] %s591_s13 }
  0x42   : > { %s1770_s16 = sshra.s32 %s592_s13, 4  ;;  %s1771_s16 = int_to_ptr.hbm [resolvable:$true] %s1770_s16 }
  0x43   : > { %s1772_s15 = scalar_lea.hbm %s1771_s16, 8  ;;  %p1778_p13 = scmp.lt.s32.totalorder %s1771_s16, %s2791_s10 }
  0x44   : > { %p1773_p8 = scmp.ne.s32.totalorder %s1771_s16, %s1772_s15  ;;  %p1779_p0 = scmp.lt.s32.totalorder %s1777_s17, %s1772_s15 }
  0x46   : > { %p1775_p10 = pnand %p1774_p9, %p1773_p8  ;;  %p1780_p2 = por %p1779_p0, %p1778_p13 }
  0x48   : > { %p1776_p11 = pneg %p1775_p10 }
  0x4a   : > { %p1781_p1 = pnand %p1780_p2, %p1776_p11 }
  0x4c   : > { %1784 = shalt.err (!%p1781_p1)
}
  0x4d   : > { %1620 = dma.hbm_to_vmem [thread:$0]  (!%p2376_p7), %s592_s13, 128, %s594_s11, %s2386_s22  }
  0x4e   : > { %s2792_s4 = sld [smem:[#allocation41_spill]]  ;;  %s2184_s28 = smov [#allocation10]  }
  0x4f   : > { %s508_s16 = sshll.u32 %s2184_s28, 4  ;;  %s2793_s6 = sld [smem:[#allocation43_spill]]  ;;  %s509_s16 = int_to_ptr.vmem [resolvable:$true] %s508_s16 }
  0x50   : > { %s2794_s0 = smov 8   ;;  %s2795_s10 = smov 128  }
  0x51   : > { %s2185_s11 = smov [#allocation13]   ;;  %s2796_s28 = sld [smem:[#allocation37_spill]] }
  0x52   : > { %s536_s13 = sshll.u32 %s2185_s11, 4  ;;  %s566_s17 = scalar_lea.vmem [#allocation2], %s2371_s5  ;;  %s537_s13 = int_to_ptr.vmem [resolvable:$true] %s536_s13 }
  0x54   : > { %s506_s27 = sshll.u32 %s2792_s4, 4  ;;  %s574_s4 = sshll.u32 %s566_s17, 4  ;;  %s507_s27 = int_to_ptr.hbm [resolvable:$true] %s506_s27  ;;  %s575_s4 = int_to_ptr.vmem [resolvable:$true] %s574_s4 }
  0x55   : > { %s534_s24 = sshll.u32 %s2793_s6, 4  ;;  %s535_s24 = int_to_ptr.hbm [resolvable:$true] %s534_s24 }
  0x56   : > { %1607 = dma.hbm_to_vmem [thread:$0]  (!%p2321_p6), %s507_s27, 256, %s509_s16, [#allocation9], %s2795_s10, %s2795_s10, %s2794_s0  }
  0x57   : > { %1613 = dma.hbm_to_vmem [thread:$0]  (!%p2321_p6), %s535_s24, 512, %s537_s13, [#allocation12], %s2795_s10, %s2795_s10, %s2794_s0  }
  0x58   : > { %s570_s15 = scalar_lea.hbm %s2796_s28, %s2374_s19  ;;  %s2797_s27 = sand.u32 1, %s2174_s26  }
  0x59   : > { %s572_s6 = sshll.u32 %s570_s15, 4  ;;  %s563_s16 = scalar_lea.sflag [#allocation3], %s2797_s27  ;;  %s573_s6 = int_to_ptr.hbm [resolvable:$true] %s572_s6 }
  0x5a   : > { %s1860_s14 = sshra.s32 %s573_s6, 4  ;;  %s1867_s24 = scalar_lea.hbm %s2796_s28, 16  ;;  %s1861_s14 = int_to_ptr.hbm [resolvable:$true] %s1860_s14 }
  0x5b   : > { %s1862_s11 = scalar_lea.hbm %s1861_s14, 8  ;;  %p1868_p6 = scmp.lt.s32.totalorder %s1861_s14, %s2796_s28 }
  0x5c   : > { %p1863_p1 = scmp.ne.s32.totalorder %s1861_s14, %s1862_s11  ;;  %p1869_p11 = scmp.lt.s32.totalorder %s1867_s24, %s1862_s11 }
  0x5e   : > { %p1865_p8 = pnand %p1863_p1, %p1774_p9  ;;  %p1870_p13 = por %p1869_p11, %p1868_p6 }
  0x60   : > { %p1866_p10 = pneg %p1865_p8 }
  0x62   : > { %p1871_p0 = pnand %p1870_p13, %p1866_p10 }
  0x64   : > { %1874 = shalt.err (!%p1871_p0)
}
  0x65   : > { %1617 = dma.hbm_to_vmem [thread:$0]  (!%p2376_p7), %s573_s6, 128, %s575_s4, %s563_s16  }
  0x66   : > { %s2798_s2 = sld [smem:[#allocation39_spill]]  ;;  %s604_s17 = scalar_lea.vmem [#allocation7], %s2371_s5 }
  0x67   : > { %s612_s27 = sshll.u32 %s604_s17, 4  ;;  %s613_s27 = int_to_ptr.vmem [resolvable:$true] %s612_s27 }
  0x6c   : > { %s608_s15 = scalar_lea.hbm %s2798_s2, %s2374_s19  ;;  %s1897_s4 = scalar_lea.hbm %s2798_s2, 16 }
  0x6d   : > { %s610_s10 = sshll.u32 %s608_s15, 4  ;;  %s611_s10 = int_to_ptr.hbm [resolvable:$true] %s610_s10 }
  0x6e   : > { %s1890_s14 = sshra.s32 %s611_s10, 4  ;;  %s1891_s14 = int_to_ptr.hbm [resolvable:$true] %s1890_s14 }
  0x6f   : > { %s1892_s11 = scalar_lea.hbm %s1891_s14, 8  ;;  %p1898_p10 = scmp.lt.s32.totalorder %s1891_s14, %s2798_s2 }
  0x70   : > { %p1893_p2 = scmp.ne.s32.totalorder %s1891_s14, %s1892_s11  ;;  %p1899_p6 = scmp.lt.s32.totalorder %s1897_s4, %s1892_s11 }
  0x72   : > { %p1895_p1 = pnand %p1893_p2, %p1774_p9  ;;  %p1900_p11 = por %p1899_p6, %p1898_p10 }
  0x74   : > { %p1896_p8 = pneg %p1895_p1 }
  0x76   : > { %p1901_p13 = pnand %p1900_p11, %p1896_p8 }
  0x78   : > { %1904 = shalt.err (!%p1901_p13)
}
  0x79   : > { %1623 = dma.hbm_to_vmem [thread:$0]  (!%p2376_p7), %s611_s10, 128, %s613_s27, %s2386_s22  }
  0x7a   : > { %621 = sbr.rel (%p2309_p3) target bundleno = 1162 (0x48a), region = 64  ;;  %s2456_s19 = sand.u32 (!%p2309_p3), 1, %s2170_s25  }
  0x7b   : > { %s2459_s5 = sshll.u32 (!%p2309_p3), %s2456_s19, 3  ;;  %s624_s0 = scalar_lea.sflag (!%p2309_p3), [#allocation3], %s2456_s19 }
  0x7c   : > { %s627_s13 = scalar_lea.vmem (!%p2309_p3), [#allocation2], %s2459_s5 }
  0x7f   : > { %2133 = dma.done.wait (%p2352_p12), %s624_s0, 128  }
  0x80   : > { %2135 = vsyncadd (%p2352_p12), %s624_s0, 4294967168  ;;  %s2468_s18 = sand.u32 1, %s2304_s30   ;;  %s637_s22 = scalar_lea.vmem [#allocation5], %s2459_s5 }
  0x81   : > { %s634_s20 = scalar_lea.sflag [#allocation6], %s2468_s18 }
  0x82   : > { %2137 = dma.done.wait (%p2352_p12), %s634_s20, 256  }
  0x83   : > { %2139 = vsyncadd (%p2352_p12), %s634_s20, 4294967040  ;;  %s647_s21 = scalar_lea.vmem [#allocation7], %s2459_s5  ;;  %p2799_p3 = scmp.eq.s32.totalorder %s2304_s30, 0 }
  0x85   : > { %2141 = dma.done.wait (%p2799_p3), [#allocation9], 512   ;;  %p2800_p7 = pmov %p2799_p3 }
  0x86   : > { %p2801_p9 = pmov %p2799_p3 }
  0x87   : > { %2143 = vsyncadd (%p2800_p7), [#allocation9], 4294966784 }
  0x88   : > { %2145 = dma.done.wait (%p2801_p9), [#allocation12], 768   ;;  %p2802_p0 = pmov %p2799_p3 }
  0x89   : > { %v793_v0 = vld [vmem:[#allocation10 + $0x8] sm:$0xff]  ;;  %v792_v1 = vld [vmem:[#allocation10] sm:$0xff]  ;;  %v760_v2 = vld [vmem:[%s637_s22] sm:$0xff]  ;;  %vm768_vm0 = vcmask 130048   ;;  %s2803_s8 = sld [smem:[#allocation45_spill]]  ;;  %vm1000_vm1 = vcmask 261120  }
  0x8a   : > { %2147 = vsyncadd (%p2802_p0), [#allocation12], 4294966528  ;;  %815 = vmatpush.msra.mxu1 %v793_v0  ;;  %v763_v3 = vld [vmem:[#allocation8 + $0x8] sm:$0xff]  ;;  %v762_v4 = vld [vmem:[#allocation8] sm:$0xff]  ;;  %s2804_s7 = sld [smem:[#allocation44_spill]]  ;;  %s2186_s27 = smov 112  }
  0x8b   : > { %786 = vmatpush.msra.mxu0 %v763_v3  ;;  %v759_v5 = vld [vmem:[%s627_s13] sm:$0xff]  ;;  %s723_s10 = scalar_lea.vmem [#allocation15], %s2459_s5  ;;  %s2754_s14 = scalar_lea.vmem [#allocation14], %s2459_s5  ;;  %vm876_vm3 = vcmask 64512   ;;  %v822_v18 = vld [vmem:[#allocation11 + $0x8] sm:$0xff]  ;;  %v821_v19 = vld [vmem:[#allocation11] sm:$0xff] }
  0x8c   : > { %816 = vmatpush.msra.mxu1 %v792_v1  ;;  %v761_v14 = vld [vmem:[%s647_s21] sm:$0xff]  ;;  %s1529_s11 = sshll.u32 %s2456_s19, 4  ;;  %841 = vmatpush.msra.mxu2 %v822_v18  ;;  %s2805_s9 = sld [smem:[#allocation46_spill]]  ;;  %v995_v47 = vld [vmem:[#allocation13 + $0x18] sm:$0xff]  ;;  %v994_v48 = vld [vmem:[#allocation13 + $0x10] sm:$0xff] }
  0x8d   : > { %1534 = vmatmul.msk.f32.vlgmr.msra.gmra.mxu1 %vm768_vm0, %v760_v2  ;;  %787 = vmatpush.msra.mxu0 %v762_v4  ;;  %vm847_vm2 = vcmp.gt.f32.partialorder %v761_v14, 0.0  ;;  %s2512_s23 = scalar_lea.vmem [#allocation18], %s1529_s11  ;;  %s2753_s6 = scalar_lea.vmem [#allocation17], %s2459_s5  ;;  %v993_v49 = vld [vmem:[#allocation13 + $0x8] sm:$0xff]  ;;  %v992_v51 = vld [vmem:[#allocation13] sm:$0xff] }
  0x8e   : > { %1533 = vmatmul.msk.f32.vlgmr.msra.gmra.mxu0 %vm768_vm0, %v759_v5  ;;  %842 = vmatpush.msra.mxu2 %v821_v19  ;;  %s744_s16 = scalar_lea.vmem [#allocation20], %s1529_s11  ;;  %s2187_s0 = smov 16  }
  0x8f   : > { %v1698_v6 = vld [vmem:[%s2803_s8] ss:$0 sm:$0xff]  ;;  %1535 = vmatmul.msk.f32.vlgmr.msra.gmra.mxu2 %vm768_vm0, %v760_v2  ;;  %s1114_s13 = sshll.u32 %s2512_s23, 4  ;;  %s1131_s20 = sshll.u32 %s744_s16, 4  ;;  %s2544_s13 = int_to_ptr.vmem [resolvable:$true] %s1114_s13  ;;  %s2546_s20 = int_to_ptr.vmem [resolvable:$true] %s1131_s20 }
  0x90   : > { %v1699_v7 = vld [vmem:[%s2804_s7] ss:$0 sm:$0xff]  ;;  %s2755_s22 = scalar_lea.vmem [#allocation21], %s2459_s5  ;;  %s2549_s21 = sshll.u32 %s2304_s30, 3 }
  0x91   : > { %s1563_s1 = sshll.u32 %s2304_s30, 4  ;;  %s2806_s12 = sld [smem:[#allocation49_spill]] }
  0x92   : > { %v1700_v25 = vld [vmem:[%s2805_s9] ss:$0 sm:$0xff]  ;;  %s1086_s4 = sshll.u32 %s723_s10, 4  ;;  %s1087_s4 = int_to_ptr.vmem [resolvable:$true] %s1086_s4 }
  0x97   : > { %s1084_s17 = scalar_lea.hbm %s2806_s12, %s2549_s21 }
 0x10a   : > { %v818_v8 = vpop.f32.mrf.mxu1 }
 0x10b   : > { %v819_v9 = vadd.f32 %v1698_v6, %v818_v8  ;;  %v789_v10 = vpop.f32.mrf.mxu0 }
 0x10c   : > { %v790_v11 = vadd.f32 %v1699_v7, %v789_v10 }
 0x10d   : > { %916 = vrot.lane.b32.xlu0 %v819_v9, %s2186_s27  ;;  %1536 = vmatpush.xpose.msk.msra.mxu3 %vm768_vm0, %v819_v9  ;;  %1025 = vst.msk [vmem:[%s723_s10] sm:$0xff] %vm1000_vm1, %v819_v9 }
 0x10e   : > { %1024 = vst.msk [vmem:[%s2754_s14] sm:$0xff] %vm1000_vm1, %v790_v11 }
 0x110   : > { %1537 = vmatmul.msk.f32.vlgmr.msra.gmra.mxu3 %vm768_vm0, %v790_v11 }
 0x111   : > { %1016 = vmatpush.msrb.mxu3 %v995_v47 }
 0x112   : > { %v844_v26 = vpop.f32.mrf.mxu2 }
 0x113   : > { %v845_v27 = vadd.f32 %v1700_v25, %v844_v26  ;;  %1017 = vmatpush.msrb.mxu3 %v994_v48 }
 0x115   : > { %914 = vrot.lane.b32.xlu0 %v790_v11, %s2186_s27  ;;  %907 = vmatpush.msrb.mxu0 %v845_v27  ;;  %1026 = vst.msk [vmem:[%s2753_s6] sm:$0xff] %vm1000_vm1, %v845_v27 }
 0x116   : > { %1018 = vmatpush.msrb.mxu3 %v993_v49 }
 0x118   : > { %1019 = vmatpush.msrb.mxu3 %v992_v51 }
 0x17f   : > { %v917_v12 = vpop.permute.xlu0 %916 }
 0x180   : > { %1539 = vmatpush.xpose.msk.msrb.mxu1 %vm768_vm0, %v917_v12 }
 0x187   : > { %v915_v13 = vpop.permute.xlu0 %914 }
 0x188   : > { %1540 = vmatmul.msk.f32.vlgmr.msrb.gmra.mxu1 %vm768_vm0, %v915_v13 }
 0x193   : > { %v871_v15 = vpop.f32.mrf.mxu3 }
 0x194   : > { %v874_v16 = vmul.f32 0.25, %v871_v15 }
 0x196   : > { %v875_v17 = vsel %vm847_vm2, %v874_v16, -3.4028235e+38 }
 0x197   : > { %912 = vst.msk [vmem:[%s2512_s23] sm:$0xff] %vm876_vm3, %v875_v17  ;;  %v877_v24 = vsel %vm876_vm3, %v875_v17, -inf }
 0x205   : > { %v939_v20 = vpop.f32.mrf.mxu1 }
 0x206   : > { %v942_v21 = vmul.f32 0.25, %v939_v20 }
 0x208   : > { %v943_v22 = vsel %vm847_vm2, %v942_v21, -3.4028235e+38 }
 0x209   : > { %1542 = vst.msk [vmem:[%s2512_s23 + $0x8] sm:$0xff] %vm876_vm3, %v943_v22  ;;  %v944_v23 = vsel %vm876_vm3, %v943_v22, -inf  ;;  %s2807_s23 = sld [smem:[#allocation51_spill]] }
 0x20a   : > { %945 = vmax.xlane.f32.xlu1 %v944_v23 }
 0x20f   : > { %s1113_s24 = scalar_lea.hbm %s2807_s23, %s1563_s1 }
 0x212   : > { %878 = vmax.xlane.f32.xlu1 %v877_v24 }
 0x27d   : > { %v946_v28 = vpop.xlane.xlu1 %945 }
 0x27e   : > { %v947_v29 = vsub.f32 %v943_v22, %v946_v28 }
 0x280   : > { %v948_v30 = vmul.f32 1.442695, %v947_v29 }
 0x282   : > { %1702 = vpow2.f32 %v948_v30 }
 0x285   : > { %v879_v31 = vpop.xlane.xlu1 %878 }
 0x286   : > { %v880_v32 = vsub.f32 %v875_v17, %v879_v31 }
 0x288   : > { %v1703_v33 = vpop.eup %1702  ;;  %v881_v34 = vmul.f32 1.442695, %v880_v32 }
 0x289   : > { %v950_v35 = vsel %vm876_vm3, %v1703_v33, 0.0 }
 0x28a   : > { %1704 = vpow2.f32 %v881_v34  ;;  %951 = vadd.xlane.f32.xlu2 %v950_v35 }
 0x290   : > { %v1705_v36 = vpop.eup %1704 }
 0x291   : > { %v883_v37 = vsel %vm876_vm3, %v1705_v36, 0.0 }
 0x292   : > { %884 = vadd.xlane.f32.xlu0 %v883_v37 }
 0x2a2   : > { %957 = vrot.lane.b32.xlu2 %v845_v27, %s2186_s27 }
 0x2fd   : > { %v952_v38 = vpop.xlane.xlu2 %951 }
 0x2fe   : > { %1706 = vrcp.f32 %v952_v38 }
 0x304   : > { %v1707_v39 = vpop.eup %1706 }
 0x305   : > { %v954_v40 = vmul.f32 %v1707_v39, %v1703_v33  ;;  %v958_v41 = vpop.permute.xlu2 %957  ;;  %v885_v42 = vpop.xlane.xlu0 %884 }
 0x306   : > { %1708 = vrcp.f32 %v885_v42  ;;  %978 = vmatpush.msrb.mxu2 %v958_v41 }
 0x307   : > { %v955_v43 = vmul.f32 %v954_v40, %v761_v14 }
 0x309   : > { %1541 = vmatmul.msk.f32.vlgmr.msrb.gmra.mxu2 %vm876_vm3, %v955_v43  ;;  %1543 = vst.msk [vmem:[%s744_s16 + $0x8] sm:$0xff] %vm876_vm3, %v955_v43 }
 0x30c   : > { %v1709_v44 = vpop.eup %1708 }
 0x30d   : > { %v887_v45 = vmul.f32 %v1709_v44, %v1705_v36 }
 0x30f   : > { %v888_v46 = vmul.f32 %v887_v45, %v761_v14 }
 0x311   : > { %1538 = vmatmul.msk.f32.vlgmr.msrb.gmra.mxu0 %vm876_vm3, %v888_v46  ;;  %913 = vst.msk [vmem:[%s744_s16] sm:$0xff] %vm876_vm3, %v888_v46  ;;  %s1088_s16 = sshll.u32 %s1084_s17, 4  ;;  %s1089_s16 = int_to_ptr.hbm [resolvable:$true] %s1088_s16 }
 0x312   : > { %s1934_s6 = sshra.s32 %s1089_s16, 4  ;;  %s1935_s6 = int_to_ptr.hbm [resolvable:$true] %s1934_s6 }
 0x313   : > { %s1936_s14 = scalar_lea.hbm %s1935_s6, 8  ;;  %p1941_p8 = scmp.lt.s32.totalorder %s1935_s6, %s2806_s12 }
 0x314   : > { %p1937_p12 = scmp.ne.s32.totalorder %s1935_s6, %s1936_s14 }
 0x316   : > { %p1938_p2 = pnand %p1937_p12, %p2361_p4 }
 0x318   : > { %p1939_p1 = pneg %p1938_p2 }
 0x38c   : > { %v980_v50 = vpop.f32.mrf.mxu2 }
 0x38d   : > { %988 = vrot.lane.b32.xlu1 %v980_v50, %s2187_s0  ;;  %s2756_s0 = scalar_lea.sflag [#allocation16], %s2468_s18 }
 0x38e   : > { %v909_v52 = vpop.f32.mrf.mxu0 }
 0x3ff   : > { %v989_v53 = vpop.permute.xlu1 %988 }
 0x400   : > { %v991_v54 = vsel %vm768_vm0, %v909_v52, %v989_v53 }
 0x401   : > { %1544 = vmatmul.msk.f32.vlgmr.msrb.gmra.mxu3 %vm1000_vm1, %v991_v54  ;;  %1027 = vst.msk [vmem:[%s2755_s22] sm:$0xff] %vm1000_vm1, %v991_v54  ;;  %s1940_s22 = scalar_lea.hbm %s2806_s12, 16 }
 0x402   : > { %p1942_p10 = scmp.lt.s32.totalorder %s1940_s22, %s1936_s14 }
 0x404   : > { %p1943_p6 = por %p1942_p10, %p1941_p8 }
 0x406   : > { %p1944_p11 = pnand %p1943_p6, %p1939_p1 }
 0x408   : > { %1947 = shalt.err (!%p1944_p11)
}
 0x409   : > { %1588 = dma.vmem_to_hbm [thread:$0]  (%p2361_p4), %s1087_s4, 128, %s1089_s16, %s2756_s0  }
 0x40a   : > { %s1116_s10 = sshll.u32 %s1113_s24, 4  ;;  %s2757_s17 = scalar_lea.sflag [#allocation19], %s2468_s18  ;;  %s1117_s10 = int_to_ptr.hbm [resolvable:$true] %s1116_s10 }
 0x40b   : > { %s1962_s11 = sshra.s32 %s1117_s10, 4  ;;  %s1968_s6 = scalar_lea.hbm %s2807_s23, 32  ;;  %s1963_s11 = int_to_ptr.hbm [resolvable:$true] %s1962_s11 }
 0x40c   : > { %s1964_s3 = scalar_lea.hbm %s1963_s11, 16  ;;  %p1969_p9 = scmp.lt.s32.totalorder %s1963_s11, %s2807_s23 }
 0x40d   : > { %p1965_p13 = scmp.ne.s32.totalorder %s1963_s11, %s1964_s3  ;;  %p1970_p0 = scmp.lt.s32.totalorder %s1968_s6, %s1964_s3 }
 0x40f   : > { %p1966_p3 = pnand %p1965_p13, %p2361_p4  ;;  %p1971_p12 = por %p1970_p0, %p1969_p9 }
 0x411   : > { %p1967_p7 = pneg %p1966_p3 }
 0x413   : > { %p1972_p2 = pnand %p1971_p12, %p1967_p7 }
 0x415   : > { %1975 = shalt.err (!%p1972_p2)
}
 0x416   : > { %s2758_s24 = smov 128   ;;  %s2189_s4 = smov 8  }
 0x417   : > { %1590 = dma.vmem_to_hbm [thread:$0]  (%p2361_p4), %s2544_s13, 256, %s1117_s10, %s2757_s17, %s2758_s24, %s2758_s24, %s2189_s4  }
 0x418   : > { %s2808_s11 = sld [smem:[#allocation52_spill]]  ;;  %s2810_s0 = scalar_lea.vmem [#allocation21], %s2459_s5 }
 0x419   : > { %s2809_s22 = sld [smem:[#allocation53_spill]]  ;;  %s1148_s7 = sshll.u32 %s2810_s0, 4  ;;  %s1149_s7 = int_to_ptr.vmem [resolvable:$true] %s1148_s7 }
 0x41a   : > { %s1055_s9 = scalar_lea.sflag [#allocation22], %s2468_s18 }
 0x41e   : > { %s1130_s3 = scalar_lea.hbm %s2808_s11, %s1563_s1 }
 0x41f   : > { %s1133_s2 = sshll.u32 %s1130_s3, 4  ;;  %s1146_s15 = scalar_lea.hbm %s2809_s22, %s2549_s21  ;;  %s2602_s2 = int_to_ptr.hbm [resolvable:$true] %s1133_s2 }
 0x420   : > { %s1150_s8 = sshll.u32 %s1146_s15, 4  ;;  %s1996_s10 = scalar_lea.hbm %s2809_s22, 16  ;;  %s1151_s8 = int_to_ptr.hbm [resolvable:$true] %s1150_s8 }
 0x421   : > { %s1990_s12 = sshra.s32 %s1151_s8, 4  ;;  %s1991_s12 = int_to_ptr.hbm [resolvable:$true] %s1990_s12 }
 0x422   : > { %s1992_s30 = scalar_lea.hbm %s1991_s12, 8  ;;  %p1997_p6 = scmp.lt.s32.totalorder %s1991_s12, %s2809_s22 }
 0x423   : > { %p1993_p1 = scmp.ne.s32.totalorder %s1991_s12, %s1992_s30  ;;  %p1998_p11 = scmp.lt.s32.totalorder %s1996_s10, %s1992_s30 }
 0x425   : > { %p1994_p8 = pnand %p1993_p1, %p2361_p4  ;;  %p1999_p13 = por %p1998_p11, %p1997_p6 }
 0x427   : > { %p1995_p10 = pneg %p1994_p8 }
 0x429   : > { %p2000_p3 = pnand %p1999_p13, %p1995_p10 }
 0x42b   : > { %2003 = shalt.err (!%p2000_p3)
}
 0x42c   : > { %1592 = dma.vmem_to_hbm [thread:$0]  (%p2361_p4), %s1149_s7, 128, %s1151_s8, %s1055_s9  }
 0x42d   : > { %s2811_s14 = sld [smem:[#allocation48_spill]]  ;;  %s2812_s15 = scalar_lea.vmem [#allocation14], %s2459_s5 }
 0x42e   : > { %s1072_s12 = sshll.u32 %s2812_s15, 4  ;;  %s2813_s10 = sld [smem:[#allocation50_spill]]  ;;  %s1073_s12 = int_to_ptr.vmem [resolvable:$true] %s1072_s12 }
 0x42f   : > { %s1030_s27 = scalar_lea.sflag [#allocation4], %s2456_s19 }
 0x433   : > { %s1070_s6 = scalar_lea.hbm %s2811_s14, %s2549_s21  ;;  %s2024_s0 = scalar_lea.hbm %s2811_s14, 16 }
 0x434   : > { %s1074_s30 = sshll.u32 %s1070_s6, 4  ;;  %s1098_s16 = scalar_lea.hbm %s2813_s10, %s2549_s21  ;;  %s1075_s30 = int_to_ptr.hbm [resolvable:$true] %s1074_s30 }
 0x435   : > { %s2018_s17 = sshra.s32 %s1075_s30, 4  ;;  %s2019_s17 = int_to_ptr.hbm [resolvable:$true] %s2018_s17 }
 0x436   : > { %s2020_s24 = scalar_lea.hbm %s2019_s17, 8  ;;  %p2025_p12 = scmp.lt.s32.totalorder %s2019_s17, %s2811_s14 }
 0x437   : > { %p2021_p7 = scmp.ne.s32.totalorder %s2019_s17, %s2020_s24  ;;  %p2026_p2 = scmp.lt.s32.totalorder %s2024_s0, %s2020_s24 }
 0x439   : > { %p2022_p9 = pnand %p2021_p7, %p2361_p4  ;;  %p2027_p1 = por %p2026_p2, %p2025_p12 }
 0x43b   : > { %p2023_p0 = pneg %p2022_p9 }
 0x43d   : > { %p2028_p8 = pnand %p2027_p1, %p2023_p0 }
 0x43f   : > { %2031 = shalt.err (!%p2028_p8)
}
 0x440   : > { %1587 = dma.vmem_to_hbm [thread:$0]  (%p2361_p4), %s1073_s12, 128, %s1075_s30, %s1030_s27  }
 0x441   : > { %s2814_s19 = scalar_lea.vmem [#allocation17], %s2459_s5  ;;  %s1102_s13 = sshll.u32 %s1098_s16, 4  ;;  %s1103_s13 = int_to_ptr.hbm [resolvable:$true] %s1102_s13 }
 0x442   : > { %s1100_s6 = sshll.u32 %s2814_s19, 4  ;;  %s2046_s1 = sshra.s32 %s1103_s13, 4  ;;  %s1101_s6 = int_to_ptr.vmem [resolvable:$true] %s1100_s6  ;;  %s2047_s1 = int_to_ptr.hbm [resolvable:$true] %s2046_s1 }
 0x443   : > { %s2048_s7 = scalar_lea.hbm %s2047_s1, 8  ;;  %s2052_s8 = scalar_lea.hbm %s2813_s10, 16 }
 0x444   : > { %p2049_p10 = scmp.ne.s32.totalorder %s2047_s1, %s2048_s7  ;;  %p2053_p13 = scmp.lt.s32.totalorder %s2047_s1, %s2813_s10 }
 0x445   : > { %p2054_p3 = scmp.lt.s32.totalorder %s2052_s8, %s2048_s7 }
 0x446   : > { %p2050_p6 = pnand %p2049_p10, %p2361_p4 }
 0x447   : > { %p2055_p7 = por %p2054_p3, %p2053_p13 }
 0x448   : > { %p2051_p11 = pneg %p2050_p6 }
 0x44a   : > { %p2056_p9 = pnand %p2055_p7, %p2051_p11 }
 0x44c   : > { %2059 = shalt.err (!%p2056_p9)
}
 0x44d   : > { %s2815_s12 = scalar_lea.sflag [#allocation16], %s2468_s18  ;;  %s2074_s30 = sshra.s32 %s2602_s2, 4  ;;  %s2075_s30 = int_to_ptr.hbm [resolvable:$true] %s2074_s30 }
 0x44e   : > { %1589 = dma.vmem_to_hbm [thread:$0]  (%p2361_p4), %s1101_s6, 128, %s1103_s13, %s2815_s12  }
 0x44f   : > { %s2076_s16 = scalar_lea.hbm %s2075_s30, 16  ;;  %s2080_s19 = scalar_lea.hbm %s2808_s11, 32 }
 0x450   : > { %p2077_p0 = scmp.ne.s32.totalorder %s2075_s30, %s2076_s16  ;;  %p2081_p1 = scmp.lt.s32.totalorder %s2075_s30, %s2808_s11 }
 0x451   : > { %p2082_p8 = scmp.lt.s32.totalorder %s2080_s19, %s2076_s16 }
 0x452   : > { %p2078_p12 = pnand %p2077_p0, %p2361_p4 }
 0x453   : > { %p2083_p10 = por %p2082_p8, %p2081_p1 }
 0x454   : > { %p2079_p2 = pneg %p2078_p12 }
 0x456   : > { %p2084_p6 = pnand %p2083_p10, %p2079_p2 }
 0x458   : > { %2087 = shalt.err (!%p2084_p6)
}
 0x459   : > { %s2816_s6 = smov 128   ;;  %s2817_s13 = scalar_lea.sflag [#allocation19], %s2468_s18 }
 0x45a   : > { %1591 = dma.vmem_to_hbm [thread:$0]  (%p2361_p4), %s2546_s20, 256, %s2602_s2, %s2817_s13, %s2816_s6, %s2816_s6, %s2189_s4  }
 0x45b   : > { %s2818_s8 = sld [smem:[#allocation54_spill]]  ;;  %s758_s16 = scalar_lea.vmem [#allocation23], %s2459_s5 }
 0x45c   : > { %s2819_s30 = sld [smem:[#allocation47_spill]]  ;;  %s1162_s27 = sshll.u32 %s758_s16, 4  ;;  %s1163_s27 = int_to_ptr.vmem [resolvable:$true] %s1162_s27 }
 0x461   : > { %s1160_s0 = scalar_lea.hbm %s2818_s8, %s2549_s21  ;;  %s2108_s2 = scalar_lea.hbm %s2818_s8, 16 }
 0x462   : > { %v1701_v55 = vld [vmem:[%s2819_s30] ss:$0 sm:$0xff]  ;;  %s1164_s15 = sshll.u32 %s1160_s0, 4  ;;  %s1165_s15 = int_to_ptr.hbm [resolvable:$true] %s1164_s15 }
 0x463   : > { %s2102_s19 = sshra.s32 %s1165_s15, 4  ;;  %s2103_s19 = int_to_ptr.hbm [resolvable:$true] %s2102_s19 }
 0x464   : > { %s2104_s20 = scalar_lea.hbm %s2103_s19, 8  ;;  %p2109_p7 = scmp.lt.s32.totalorder %s2103_s19, %s2818_s8 }
 0x465   : > { %p2105_p11 = scmp.ne.s32.totalorder %s2103_s19, %s2104_s20  ;;  %p2110_p9 = scmp.lt.s32.totalorder %s2108_s2, %s2104_s20 }
 0x467   : > { %p2106_p13 = pnand %p2105_p11, %p2361_p4  ;;  %p2111_p0 = por %p2110_p9, %p2109_p7 }
 0x469   : > { %p2107_p3 = pneg %p2106_p13 }
 0x46b   : > { %p2112_p12 = pnand %p2111_p0, %p2107_p3 }
 0x484   : > { %v1021_v56 = vpop.f32.mrf.mxu3 }
 0x485   : > { %v1022_v57 = vadd.f32 %v1701_v55, %v1021_v56 }
 0x487   : > { %1028 = vst.msk [vmem:[%s758_s16] sm:$0xff] %vm1000_vm1, %v1022_v57 }
 0x488   : > { %2115 = shalt.err (!%p2112_p12)
}
 0x489   : > { %1593 = dma.vmem_to_hbm [thread:$0]  (%p2361_p4), %s1163_s27, 128, %s1165_s15, %s1055_s9  }
 0x48a PF: > { %s2820_s7 = sld [smem:[#allocation32_spill]] }
 0x48b   : > { %s2822_s13 = sld [smem:[#allocation33_spill]] }
 0x490   : > { %s1176_s17 = sand.u32 1, %s2820_s7  }
 0x491   : > { %p2823_p2 = scmp.ge.s32.totalorder %s2822_s13, 2  ;;  %s1177_s24 = scalar_lea.sflag [#allocation4], %s1176_s17 }
 0x493   : > { %p1625_p1 = pnand %p2823_p2, %p2365_p5 }
 0x495   : > { %p1626_p8 = pneg %p1625_p1 }
 0x497   : > { %2149 = dma.done.wait (%p1626_p8), %s1177_s24, 128  }
 0x498   : > { %2151 = vsyncadd (%p1626_p8), %s1177_s24, 4294967168  ;;  %s2824_s0 = sadd.s32 4294967294, %s2822_s13  }
 0x499   : > { %s1186_s3 = sand.u32 1, %s2824_s0  }
 0x49a   : > { %s1187_s12 = scalar_lea.sflag [#allocation16], %s1186_s3 }
 0x49b   : > { %2153 = dma.done.wait (%p1626_p8), %s1187_s12, 256  }
 0x49c   : > { %2155 = vsyncadd (%p1626_p8), %s1187_s12, 4294967040  ;;  %s1207_s29 = scalar_lea.sflag [#allocation19], %s1186_s3 }
 0x49d   : > { %2157 = dma.done.wait (%p1626_p8), %s1207_s29, 512  }
 0x49e   : > { %2159 = vsyncadd (%p1626_p8), %s1207_s29, 4294966784  ;;  %s1227_s9 = scalar_lea.sflag [#allocation22], %s1186_s3 }
 0x49f   : > { %2161 = dma.done.wait (%p1626_p8), %s1227_s9, 256  }
 0x4a0   : > { %2163 = vsyncadd (%p1626_p8), %s1227_s9, 4294967040  ;;  %s2825_s27 = sld [smem:[#allocation34_spill]]  ;;  %s2827_s24 = smov %s2170_s25 }
 0x4a1   : > { %s2826_s18 = sld [smem:[#allocation35_spill]]  ;;  %s2828_s25 = smov %s2174_s26 }
 0x4a6   : > { %p45_p5 = scmp.ge.s32.totalorder %s2825_s27, 4  }
 0x4a7   : > { %s2829_s26 = smov %s2826_s18 }
 0x4a8   :  { %47 = sbr.rel (!%p45_p5) target bundleno = 34 (0x22), region = 247 }
 0x4ad   :  { %1243 = vsyncpa [#allocation3], 1 }
 0x4ae   :  { %1245 = vsyncpa [#allocation3 + $0x1], 1 }
 0x4af   :  { %1246 = vsyncpa [#allocation6], 1 }
 0x4b0   :  { %1248 = vsyncpa [#allocation6 + $0x1], 1 }
 0x4b1   :  { %1249 = vsyncpa [#allocation9], 1 }
 0x4b2   :  { %1250 = vsyncpa [#allocation12], 1 }
 0x4b3   :  { %1251 = vsyncpa [#allocation4], 1 }
 0x4b4   :  { %1253 = vsyncpa [#allocation4 + $0x1], 1 }
 0x4b5   :  { %1254 = vsyncpa [#allocation16], 1 }
 0x4b6   :  { %1256 = vsyncpa [#allocation16 + $0x1], 1 }
 0x4b7   :  { %1257 = vsyncpa [#allocation19], 1 }
 0x4b8   :  { %1259 = vsyncpa [#allocation19 + $0x1], 1 }
 0x4b9   :  { %1260 = vsyncpa [#allocation22], 1 }
 0x4ba   :  { %1262 = vsyncpa [#allocation22 + $0x1], 1 }

</bundles_post_ra>
